<compile_context>
chip_gen: v5e
topology: v5e:2x2
jax: 0.10.0
libtpu: 0.0.40
codegen_flags: <defaults>
</compile_context>

<pallas_src>
import functools

import jax
import jax.numpy as jnp
from jax.experimental import pallas as pl
from jax.experimental.pallas import tpu as pltpu


def _moe_tile(x_ref, w13_ref, w2_ref, rw_ref, acc_ref, tf):
    """Adds one (expert, F-chunk) contribution into the resident accumulator."""
    e = pl.program_id(1)
    f = pl.program_id(2)

    @pl.when((e == 0) & (f == 0))
    def _init():
        acc_ref[...] = jnp.zeros_like(acc_ref)

    x = x_ref[...]                                     # (TS, D)
    w13 = w13_ref[0, 0]                                # (D, 2*TF) = [w1_f | v1_f]^T
    gu = jnp.dot(x, w13, preferred_element_type=jnp.float32)      # (TS, 2*TF)
    g = gu[:, :tf]
    u = gu[:, tf:]
    h = (g * jax.nn.sigmoid(g)) * u                    # SiLU(x w1_f^T) * (x v1_f^T), f32
    h2 = jnp.dot(h.astype(x.dtype), w2_ref[0],
                 preferred_element_type=jnp.float32)   # (TS, D)
    acc_ref[...] += h2 * rw_ref[0]                     # rw_ref[0]: (TS, 1) routing col


def dense_moe_kernel_f32(x_ref, w13_ref, w2_ref, rw_ref, out_ref, *, tf):
    # f32 output: accumulate directly into the resident output block
    # (saves the S*D*4-byte scratch and the final copy).
    _moe_tile(x_ref, w13_ref, w2_ref, rw_ref, out_ref, tf)


def dense_moe_kernel_lowp(x_ref, w13_ref, w2_ref, rw_ref, out_ref, acc_ref, *, tf):
    # bf16 (or other low-precision) output: accumulate in f32 scratch, cast once.
    _moe_tile(x_ref, w13_ref, w2_ref, rw_ref, acc_ref, tf)

    @pl.when((pl.program_id(1) == pl.num_programs(1) - 1)
             & (pl.program_id(2) == pl.num_programs(2) - 1))
    def _finalize():
        out_ref[...] = acc_ref[...].astype(out_ref.dtype)


def _pick_tile_f(F, D, itemsize, weight_budget_bytes=24 << 20):
    """Largest F-chunk (multiple of 128, dividing F) whose double-buffered
    weight stream (w13: 2*TF*D + w2: TF*D, x2 buffers) fits the budget."""
    if F % 128 != 0 or F <= 512:
        return F
    cap = (weight_budget_bytes // (6 * D * itemsize)) // 128 * 128
    tf = max(128, min(F, cap))
    while tf > 128 and F % tf != 0:
        tf -= 128
    return tf if F % tf == 0 else F


def _pick_tile_s(S):
    for ts in (512, 256, 128):
        if S % ts == 0:
            return ts
    return S


def dense_moe(x, gate_w, w1, v1, w2, *, top_k, norm_p,
              tile_f=None, tile_s=None, vmem_limit_bytes=48 << 20):
    """Matches DenseMoE.forward on a single shard (process_group.size() == 1).

    x: (S, D); gate_w: (E, D); w1, v1, w2: (E, F, D) where w1/v1 are used as
    x @ w.T (column-linear) and w2 as h @ w2 (row-linear layout).
    """
    S, D = x.shape
    E, F, _ = w1.shape

    # --- router (tiny, stays in JAX glue) ---
    gate_logits = x @ gate_w.T                                    # (S, E)
    rw = jax.nn.softmax(gate_logits.astype(jnp.float32), axis=-1)
    if top_k < E:
        # PyTorch zeroes the (E - top_k) smallest == keep the top_k largest.
        _, top_idx = jax.lax.top_k(rw, top_k)
        mask = jnp.sum(jax.nn.one_hot(top_idx, E, dtype=rw.dtype), axis=1)
        rw = rw * mask
    if norm_p:
        nrm = jnp.sum(jnp.abs(rw) ** norm_p, axis=-1, keepdims=True) ** (1.0 / norm_p)
        rw = rw / nrm
    rw = rw.astype(x.dtype)
    rw_e = jnp.transpose(rw)[:, :, None]                          # (E, S, 1)

    # --- tiling ---
    itemsize = jnp.dtype(x.dtype).itemsize
    TF = tile_f if tile_f is not None else _pick_tile_f(F, D, itemsize)
    TS = tile_s if tile_s is not None else _pick_tile_s(S)
    assert F % TF == 0 and S % TS == 0
    NF = F // TF
    NS = S // TS

    # Fuse w1/v1 per F-chunk and pre-transpose to MXU-friendly (D, 2*TF) layout.
    # (In production, pack the weights like this once at load time.)
    w13 = jnp.concatenate(
        [w1.reshape(E, NF, TF, D), v1.reshape(E, NF, TF, D)], axis=2)   # (E,NF,2TF,D)
    w13 = jnp.swapaxes(w13, 2, 3)                                       # (E,NF,D,2TF)

    out_is_f32 = jnp.dtype(x.dtype) == jnp.dtype(jnp.float32)
    if out_is_f32:
        kernel = functools.partial(dense_moe_kernel_f32, tf=TF)
        scratch_shapes = ()
    else:
        kernel = functools.partial(dense_moe_kernel_lowp, tf=TF)
        scratch_shapes = (pltpu.VMEM((TS, D), jnp.float32),)

    out = pl.pallas_call(
        kernel,
        out_shape=jax.ShapeDtypeStruct((S, D), x.dtype),
        grid_spec=pltpu.PrefetchScalarGridSpec(
            num_scalar_prefetch=0,
            grid=(NS, E, NF),
            in_specs=[
                pl.BlockSpec((TS, D), lambda s, e, f: (s, 0)),                   # x tile
                pl.BlockSpec((1, 1, D, 2 * TF), lambda s, e, f: (e, f, 0, 0)),   # [w1|v1]^T
                pl.BlockSpec((1, TF, D), lambda s, e, f: (e, f, 0)),             # w2 chunk
                pl.BlockSpec((1, TS, 1), lambda s, e, f: (e, s, 0)),             # routing col
            ],
            out_specs=pl.BlockSpec((TS, D), lambda s, e, f: (s, 0)),
            scratch_shapes=scratch_shapes,
        ),
        compiler_params=pltpu.CompilerParams(
            # S-tiles are independent (both TCs on v7x); expert & F-chunk axes
            # are the reduction feeding the resident accumulator.
            dimension_semantics=("parallel", "arbitrary", "arbitrary"),
            vmem_limit_bytes=vmem_limit_bytes,
        ),
        # Note: weight BlockSpecs could additionally take pipeline_mode=pl.Buffered(3)
        # to hide DMA bubbles at expert/F-chunk boundaries (sweep 2 vs 3).
    )(x, w13, w2, rw_e)
    # TODO(synk): multi-shard all_reduce over process_group not modeled (single shard).
    return out


def _reference(x, gate_w, w1, v1, w2, *, top_k, norm_p):
    E = w1.shape[0]
    logits = x @ gate_w.T
    rw = jax.nn.softmax(logits.astype(jnp.float32), axis=-1)
    if top_k < E:
        _, top_idx = jax.lax.top_k(rw, top_k)
        mask = jnp.sum(jax.nn.one_hot(top_idx, E, dtype=rw.dtype), axis=1)
        rw = rw * mask
    if norm_p:
        nrm = jnp.sum(jnp.abs(rw) ** norm_p, axis=-1, keepdims=True) ** (1.0 / norm_p)
        rw = rw / nrm
    rw = rw.astype(x.dtype)
    out = jnp.zeros_like(x)
    for e in range(E):
        g = x @ w1[e].T
        h = jax.nn.silu(g) * (x @ v1[e].T)
        out = out + (h @ w2[e]) * rw[:, e:e + 1]
    return out


if __name__ == "__main__":
    # Small shapes consistent with the module: seq=8, d_model=32, ffn=64, 4 experts.
    S, D, F, E = 8, 32, 64, 4
    TOP_K = 1                       # DbrxFFNConfig default moe_top_k
    NORM_P = 1                      # DbrxFFNConfig default moe_normalize_expert_weights

    key = jax.random.PRNGKey(0)
    kx, kg, k1, kv, k2 = jax.random.split(key, 5)
    x = jax.random.normal(kx, (S, D), dtype=jnp.float32)
    gate_w = 0.02 * jax.random.normal(kg, (E, D), dtype=jnp.float32)
    w1 = 0.02 * jax.random.normal(k1, (E, F, D), dtype=jnp.float32)
    v1 = 0.02 * jax.random.normal(kv, (E, F, D), dtype=jnp.float32)
    w2 = 0.02 * jax.random.normal(k2, (E, F, D), dtype=jnp.float32)

    # float32 path (accumulates directly in the resident output block).
    out = jax.block_until_ready(
        dense_moe(x, gate_w, w1, v1, w2, top_k=TOP_K, norm_p=NORM_P))
    ref = _reference(x, gate_w, w1, v1, w2, top_k=TOP_K, norm_p=NORM_P)
    assert out.shape == (S, D)
    assert jnp.allclose(out, ref, atol=1e-5, rtol=1e-5), "f32 mismatch vs reference"

    # bf16 weight/activation streaming path (f32 VMEM scratch accumulator) —
    # the production configuration recommended by the perf review.
    xb = x.astype(jnp.bfloat16)
    gb = gate_w.astype(jnp.bfloat16)
    w1b = w1.astype(jnp.bfloat16)
    v1b = v1.astype(jnp.bfloat16)
    w2b = w2.astype(jnp.bfloat16)
    out_b = jax.block_until_ready(
        dense_moe(xb, gb, w1b, v1b, w2b, top_k=TOP_K, norm_p=NORM_P))
    ref_b = _reference(xb, gb, w1b, v1b, w2b, top_k=TOP_K, norm_p=NORM_P)
    assert out_b.shape == (S, D)
    assert jnp.allclose(out_b.astype(jnp.float32), ref_b.astype(jnp.float32),
                        rtol=5e-2, atol=5e-4), "bf16 mismatch vs reference"

    print("KERNEL_OK")
</pallas_src>

<mosaic_0001>
module attributes {stable_mosaic.version = 11 : i64} {
  func.func @dense_moe_kernel_f32(%arg0: i32, %arg1: i32, %arg2: i32, %arg3: memref<8x32xf32, #tpu.memory_space<vmem>>, %arg4: memref<1x1x32x128xf32, #tpu.memory_space<vmem>>, %arg5: memref<1x64x32xf32, #tpu.memory_space<vmem>>, %arg6: memref<1x8x1xf32, #tpu.memory_space<vmem>>, %arg7: memref<8x32xf32, #tpu.memory_space<vmem>>) attributes {dimension_semantics = [#tpu.dimension_semantics<parallel>, #tpu.dimension_semantics<arbitrary>, #tpu.dimension_semantics<arbitrary>], iteration_bounds = array<i64: 1, 4, 1>, scalar_prefetch = 0 : i64, scratch_operands = 0 : i64, tpu.core_type = #tpu.core_type<tc>, window_params = [{transform_indices = @transform_0, window_bounds = array<i64: 8, 32>}, {transform_indices = @transform_1, window_bounds = array<i64: 1, 1, 32, 128>}, {transform_indices = @transform_2, window_bounds = array<i64: 1, 64, 32>}, {transform_indices = @transform_3, window_bounds = array<i64: 1, 8, 1>}, {transform_indices = @transform_4, window_bounds = array<i64: 8, 32>}]} {
    %c0_i32 = arith.constant 0 : i32
    %0 = arith.cmpi eq, %arg1, %c0_i32 : i32
    %c0_i32_0 = arith.constant 0 : i32
    %1 = arith.cmpi eq, %arg2, %c0_i32_0 : i32
    %2 = arith.andi %0, %1 : i1
    %3 = arith.extui %2 : i1 to i32
    %c0_i32_1 = arith.constant 0 : i32
    %4 = arith.cmpi ne, %3, %c0_i32_1 : i32
    scf.if %4 {
      %cst_19 = arith.constant 0.000000e+00 : f32
      %28 = vector.broadcast %cst_19 : f32 to vector<8x32xf32>
      %c0_20 = arith.constant 0 : index
      %c0_21 = arith.constant 0 : index
      %29 = vector.load %arg7[%c0_20, %c0_21] : memref<8x32xf32, #tpu.memory_space<vmem>>, vector<8x32xf32>
      tpu.vector_store %arg7[%c0_20, %c0_21], %28 {strides = array<i32>} : memref<8x32xf32, #tpu.memory_space<vmem>>, vector<8x32xf32>,
    } else {
    }
    %c0 = arith.constant 0 : index
    %c0_2 = arith.constant 0 : index
    %5 = vector.load %arg3[%c0, %c0_2] : memref<8x32xf32, #tpu.memory_space<vmem>>, vector<8x32xf32>
    %c0_3 = arith.constant 0 : index
    %c0_4 = arith.constant 0 : index
    %c0_5 = arith.constant 0 : index
    %c0_6 = arith.constant 0 : index
    %6 = vector.load %arg4[%c0_3, %c0_4, %c0_5, %c0_6] : memref<1x1x32x128xf32, #tpu.memory_space<vmem>>, vector<1x1x32x128xf32>
    %7 = vector.shape_cast %6 : vector<1x1x32x128xf32> to vector<32x128xf32>
    %cst = arith.constant dense<0.000000e+00> : vector<8x128xf32>
    %8 = tpu.matmul %5, %7, %cst {dimension_numbers = #tpu.dot_dimension_numbers<[1], [0], [0], [1], [0, 0, 1, 1], [], []>} : vector<8x32xf32>, vector<32x128xf32>, vector<8x128xf32> -> vector<8x128xf32>
    %9 = vector.extract_strided_slice %8 {offsets = [0, 0], sizes = [8, 64], strides = [1, 1]} : vector<8x128xf32> to vector<8x64xf32>
    %10 = vector.extract_strided_slice %8 {offsets = [0, 64], sizes = [8, 64], strides = [1, 1]} : vector<8x128xf32> to vector<8x64xf32>
    %11 = arith.negf %9 : vector<8x64xf32>
    %12 = math.exp %11 : vector<8x64xf32>
    %cst_7 = arith.constant 1.000000e+00 : f32
    %13 = vector.broadcast %cst_7 : f32 to vector<8x64xf32>
    %14 = arith.addf %13, %12 : vector<8x64xf32>
    %15 = arith.divf %13, %14 : vector<8x64xf32>
    %16 = arith.mulf %9, %15 : vector<8x64xf32>
    %17 = arith.mulf %16, %10 : vector<8x64xf32>
    %c0_8 = arith.constant 0 : index
    %c0_9 = arith.constant 0 : index
    %c0_10 = arith.constant 0 : index
    %18 = vector.load %arg5[%c0_8, %c0_9, %c0_10] : memref<1x64x32xf32, #tpu.memory_space<vmem>>, vector<1x64x32xf32>
    %19 = vector.shape_cast %18 : vector<1x64x32xf32> to vector<64x32xf32>
    %cst_11 = arith.constant dense<0.000000e+00> : vector<8x32xf32>
    %20 = tpu.matmul %17, %19, %cst_11 {dimension_numbers = #tpu.dot_dimension_numbers<[1], [0], [0], [1], [0, 0, 1, 1], [], []>} : vector<8x64xf32>, vector<64x32xf32>, vector<8x32xf32> -> vector<8x32xf32>
    %c0_12 = arith.constant 0 : index
    %c0_13 = arith.constant 0 : index
    %21 = vector.load %arg7[%c0_12, %c0_13] : memref<8x32xf32, #tpu.memory_space<vmem>>, vector<8x32xf32>
    %c0_14 = arith.constant 0 : index
    %c0_15 = arith.constant 0 : index
    %c0_16 = arith.constant 0 : index
    %22 = vector.load %arg6[%c0_14, %c0_15, %c0_16] : memref<1x8x1xf32, #tpu.memory_space<vmem>>, vector<1x8x1xf32>
    %23 = vector.shape_cast %22 : vector<1x8x1xf32> to vector<8x1xf32>
    %24 = vector.broadcast %23 : vector<8x1xf32> to vector<8x32xf32>
    %25 = arith.mulf %20, %24 : vector<8x32xf32>
    %26 = arith.addf %21, %25 : vector<8x32xf32>
    %c0_17 = arith.constant 0 : index
    %c0_18 = arith.constant 0 : index
    %27 = vector.load %arg7[%c0_17, %c0_18] : memref<8x32xf32, #tpu.memory_space<vmem>>, vector<8x32xf32>
    tpu.vector_store %arg7[%c0_17, %c0_18], %26 {strides = array<i32>} : memref<8x32xf32, #tpu.memory_space<vmem>>, vector<8x32xf32>,
    return
  }
  func.func @transform_0(%arg0: i32, %arg1: i32, %arg2: i32) -> (i32, i32) {
    %c0_i32 = arith.constant 0 : i32
    %c0_i32_0 = arith.constant 0 : i32
    return %arg0, %c0_i32 : i32, i32
  }
  func.func @transform_1(%arg0: i32, %arg1: i32, %arg2: i32) -> (i32, i32, i32, i32) {
    %c0_i32 = arith.constant 0 : i32
    %c0_i32_0 = arith.constant 0 : i32
    %c0_i32_1 = arith.constant 0 : i32
    return %arg1, %arg2, %c0_i32, %c0_i32_0 : i32, i32, i32, i32
  }
  func.func @transform_2(%arg0: i32, %arg1: i32, %arg2: i32) -> (i32, i32, i32) {
    %c0_i32 = arith.constant 0 : i32
    %c0_i32_0 = arith.constant 0 : i32
    return %arg1, %arg2, %c0_i32 : i32, i32, i32
  }
  func.func @transform_3(%arg0: i32, %arg1: i32, %arg2: i32) -> (i32, i32, i32) {
    %c0_i32 = arith.constant 0 : i32
    %c0_i32_0 = arith.constant 0 : i32
    return %arg1, %arg0, %c0_i32 : i32, i32, i32
  }
  func.func @transform_4(%arg0: i32, %arg1: i32, %arg2: i32) -> (i32, i32) {
    %c0_i32 = arith.constant 0 : i32
    %c0_i32_0 = arith.constant 0 : i32
    return %arg0, %c0_i32 : i32, i32
  }
}

</mosaic_0001>

<bundles_post_ra>
// kernel: tpu_custom_call.1
= control target key start
LH: loop header
LB: loop body
LE: loop exit
PB: predicated region body
PF: predicated region fallthrough
CT: control target
= control target key end

     0   :  { %9 = vsyncpa [#allocation3], 0  ;;  %s673_s15 = smov 0   ;;  %s675_s16 = smov 0   ;;  %s733_s0 = inlined_call_operand.vmem [shape: f32[8,32], index: 0, kind: input, shape index: {}]   ;;  %s734_s1 = inlined_call_operand.vmem [shape: f32[4,1,32,128], index: 1, kind: input, shape index: {}]   ;;  %s735_s2 = inlined_call_operand.vmem [shape: f32[4,64,32], index: 2, kind: input, shape index: {}]   ;;  %s736_s3 = inlined_call_operand.vmem [shape: f32[4,8,1], index: 3, kind: input, shape index: {}]   ;;  %s737_s4 = inlined_call_operand.hbm [shape: f32[8,32], index: 4, kind: output, shape index: {}]  }
   0x1   :  { %s677_s17 = smov 0  }
   0x2 LB: > { %s528_s18 = sadd.s32 4294967295, %s642_s17   ;;  %s30_s19 = sadd.s32 1, %s638_s16  ;;  %s642_s17 = sphi %s677_s17, %s15_s17   ;;  %s638_s16 = sphi %s675_s16, %s739_s16   ;;  %s634_s15 = sphi %s673_s15, %s738_s15  }
   0x3   : > { %p32_p0 = scmp.ge.s32.totalorder %s30_s19, 4  ;;  %p532_p1 = scmp.ge.s32.totalorder %s642_s17, 1 }
   0x4   : > { %p228_p2 = scmp.lt.s32.totalorder %s642_s17, 5 }
   0x5   : > { %s741_s19 = smov (%p32_p0, %s30_s19), 0 }
   0x6   : > { %p229_p3 = pnand %p532_p1, %p228_p2 }
   0x7   : > { %p277_p4 = scmp.lt.s32.totalorder (!%p229_p3), %s634_s15, 3  ;;  %p303_p5 = scmp.eq.s32.totalorder (!%p229_p3), %s634_s15, 0 }
   0x8   : > { %232 = sbr.rel (%p229_p3) target bundleno = 403 (0x193), region = 36 }
   0xd   : > { %s743_s15 = smov (!%p277_p4, %s634_s15), 3  ;;  %308 = sbr.rel (!%p303_p5) target bundleno = 18 (0x12), region = 40  ;;  %vm309_vm0 = vcmask (%p303_p5), 261120   ;;  %v644_v0 = vmov (%p303_p5), 0.0  }
   0xe   : > { %s546_s20 = sshll.u32 %s743_s15, 5  ;;  %s547_s21 = sshll.u32 %s743_s15, 6  ;;  %310 = vst.msk [vmem:[#allocation2] sm:$0xff] (%p303_p5), %vm309_vm0, %v644_v0 }
   0xf   : > { %s285_s24 = scalar_lea.vmem %s734_s1, %s546_s20  ;;  %s698_s27 = scalar_lea.vmem %s735_s2, %s547_s21 }
  0x10   : > { %s537_s28 = sshll.u32 %s743_s15, 3 }
  0x11   : > { %s703_s5 = scalar_lea.vmem %s736_s3, %s537_s28 }
  0x12 PF: > { %v315_v1 = vld [vmem:[%s285_s24 + $0x18] sm:$0xff]  ;;  %v314_v2 = vld [vmem:[%s285_s24 + $0x10] sm:$0xff]  ;;  %v313_v3 = vld [vmem:[%s285_s24 + $0x8] sm:$0xff]  ;;  %vm316_vm1 = vcmask 261120   ;;  %s645_s8 = smov 64   ;;  %v646_v19 = vmov 0  }
  0x13   : > { %332 = vmatpush.msra.mxu0 %v315_v1  ;;  %v312_v4 = vld [vmem:[%s285_s24] sm:$0xff]  ;;  %v372_v6 = vld [vmem:[%s698_s27 + $0x38] sm:$0xff]  ;;  %v371_v7 = vld [vmem:[%s698_s27 + $0x30] sm:$0xff]  ;;  %583 = vset.pattern.permute.xlu0 %v646_v19  ;;  %vm373_vm6 = vcmask 523264   ;;  %s647_s9 = smov [#allocation2]   ;;  %s417_s13 = sshll.u32 %s737_s4, 4  ;;  %s418_s13 = int_to_ptr.hbm [resolvable:$true] %s417_s13 }
  0x14   : > { %v311_v5 = vld [vmem:[%s733_s0] sm:$0xff]  ;;  %385 = vmatpush.msra.mxu1 %v372_v6  ;;  %v370_v8 = vld [vmem:[%s698_s27 + $0x28] sm:$0xff]  ;;  %v368_v11 = vld [vmem:[%s698_s27 + $0x18] sm:$0xff]  ;;  %s415_s10 = sshll.u32 %s647_s9, 4  ;;  %p553_p6 = scmp.eq.s32.totalorder %s528_s18, 3  ;;  %s416_s10 = int_to_ptr.vmem [resolvable:$true] %s415_s10 }
  0x15   : > { %333 = vmatpush.msra.mxu0 %v314_v2  ;;  %v369_v10 = vld [vmem:[%s698_s27 + $0x20] sm:$0xff]  ;;  %v367_v12 = vld [vmem:[%s698_s27 + $0x10] sm:$0xff]  ;;  %v366_v13 = vld [vmem:[%s698_s27 + $0x8] sm:$0xff] }
  0x16   : > { %386 = vmatpush.msra.mxu1 %v371_v7  ;;  %v365_v17 = vld [vmem:[%s698_s27] sm:$0xff] }
  0x17   : > { %334 = vmatpush.msra.mxu0 %v313_v3  ;;  %v398_v18 = vld [vmem:[%s703_s5] sm:$0xff] }
  0x18   : > { %387 = vmatpush.msra.mxu1 %v370_v8  ;;  %v397_v35 = vld [vmem:[#allocation2] sm:$0xff] }
  0x19   : > { %335 = vmatpush.msra.mxu0 %v312_v4 }
  0x1a   : > { %539 = vmatmul.msk.f32.vlgmr.msra.gmra.mxu0 %vm316_vm1, %v311_v5  ;;  %388 = vmatpush.msra.mxu1 %v369_v10 }
  0x1c   : > { %389 = vmatpush.msra.mxu1 %v368_v11 }
  0x1e   : > { %390 = vmatpush.msra.mxu1 %v367_v12 }
  0x20   : > { %391 = vmatpush.msra.mxu1 %v366_v13 }
  0x22   : > { %392 = vmatpush.msra.mxu1 %v365_v17 }
  0x97   : > { %v337_v9 = vpop.f32.mrf.mxu0 }
  0x98   : > { %361 = vrot.lane.b32.xlu0 %v337_v9, %s645_s8  ;;  %v540_v14 = vmul.f32 -1.442695, %v337_v9 }
  0x9a   : > { %584 = vpow2.f32 %v540_v14 }
  0xa0   : > { %v585_v15 = vpop.eup %584  ;;  %401 = vperm.xlu0 %583, %v398_v18  }
  0xa1   : > { %v343_v16 = vadd.f32 1.0, %v585_v15 }
  0xa3   : > { %586 = vrcp.f32 %v343_v16  ;;  %v355_v25 = vand.u32 2147483648, %v343_v16  ;;  %vm349_vm3 = vweird.f32 %v343_v16  ;;  %v353_v26 = vand.u32 2147483647, %v343_v16 }
  0xa5   : > { %v356_v28 = vor.u32 1.1754944e-38, %v355_v25  ;;  %vm354_vm5 = vcmp.eq.f32.partialorder %v353_v26, 8.507059e+37 }
  0xa9   : > { %v587_v20 = vpop.eup %586 }
  0xaa   : > { %v345_v21 = vmul.f32 %v587_v20, %v343_v16  ;;  %vm350_vm2 = vweird.f32 %v587_v20 }
  0xab   : > { %vm351_vm4 = vmor %vm349_vm3, %vm350_vm2 }
  0xac   : > { %v346_v22 = vsub.f32 1.0, %v345_v21 }
  0xae   : > { %v347_v23 = vmul.f32 %v587_v20, %v346_v22 }
  0xb0   : > { %v348_v24 = vadd.f32 %v587_v20, %v347_v23 }
  0xb2   : > { %v352_v27 = vsel %vm351_vm4, %v587_v20, %v348_v24 }
  0xb3   : > { %v357_v29 = vsel %vm354_vm5, %v356_v28, %v352_v27 }
  0xb4   : > { %v359_v30 = vmul.f32 %v357_v29, %v337_v9 }
 0x10a   : > { %v362_v31 = vpop.permute.xlu0 %361 }
 0x10b   : > { %v364_v32 = vmul.f32 %v362_v31, %v359_v30 }
 0x10d   : > { %541 = vmatmul.msk.f32.vlgmr.msra.gmra.mxu1 %vm373_vm6, %v364_v32 }
 0x112   : > { %v402_v33 = vpop.permute.xlu0 %401 }
 0x18a   : > { %v394_v34 = vpop.f32.mrf.mxu1 }
 0x18b   : > { %v404_v36 = vmul.f32 %v402_v33, %v394_v34 }
 0x18d   : > { %v405_v37 = vadd.f32 %v404_v36, %v397_v35 }
 0x18f   : > { %406 = vst.msk [vmem:[#allocation2] sm:$0xff] %vm316_vm1, %v405_v37 }
 0x190   : > { %550 = dma.vmem_to_hbm [thread:$0]  (%p553_p6), %s416_s10, 128, %s418_s13, [#allocation3]  }
 0x191   : > { %629 = dma.done.wait (%p553_p6), [#allocation3], 128  }
 0x192   : > { %631 = vsyncadd (%p553_p6), [#allocation3], 4294967168 }
 0x193 PF: > { %s15_s17 = sadd.s32 1, %s642_s17   ;;  %s738_s15 = smov %s638_s16 }
 0x194   : > { %p12_p7 = scmp.ge.s32.totalorder %s15_s17, 6   ;;  %s739_s16 = smov %s741_s19 }
 0x196   :  { %14 = sbr.rel (!%p12_p7) target bundleno = 2 (0x2), region = 77 }
 0x19b   :  { %431 = vsyncpa [#allocation3], 1 }
 0x19c   :  { %433 = vsyncpa [#allocation3 + $0x1], 1 }

</bundles_post_ra>
